<compile_context>
chip_gen: v5e
topology: v5e:2x2
jax: 0.10.0
libtpu: 0.0.40
codegen_flags: <defaults>
</compile_context>

<pallas_src>
import functools

import jax
import jax.numpy as jnp
from jax.experimental import pallas as pl
from jax.experimental.pallas import tpu as pltpu

N_EMBD = 32
HIDDEN = 4 * N_EMBD           # 128
DROPOUT_P = 0.2               # eval mode -> identity
LANES = 128


def _round_up(x, m):
    return (x + m - 1) // m * m


def _ffn_kernel(x_ref, w1_ref, b1_ref, w2_ref, b2_ref, o_ref):
    # x_ref:  (tmp, PACK*C)  f32   lane-dense tile: PACK tokens per 128-lane row
    # w1_ref: (PACK*C, PACK*H) bf16  block-diagonal packed W1
    # b1_ref: (1, PACK*H)    f32
    # w2_ref: (PACK*H, PACK*C) bf16  block-diagonal packed W2
    # b2_ref: (1, PACK*C)    f32
    # o_ref:  (tmp, PACK*C)  f32
    x = x_ref[...].astype(jnp.bfloat16)                       # bf16 MXU operand
    h = jnp.dot(x, w1_ref[...], preferred_element_type=jnp.float32)
    h = jnp.maximum(h + b1_ref[...], 0.0)                     # bias+ReLU in f32 (VPU, v5e-safe)
    h = h.astype(jnp.bfloat16)                                 # bf16 hidden: halves vst/vld + VMEM
    y = jnp.dot(h, w2_ref[...], preferred_element_type=jnp.float32) + b2_ref[...]
    o_ref[...] = y.astype(o_ref.dtype)                         # Dropout(eval) == identity


def _pack_weights(w1, b1, w2, b2, pack):
    """Expand weights block-diagonally so a lane-dense (rows, pack*C) token tile
    (pack tokens per row) multiplies directly:
      w1p[j*C + c, k*H + o] = delta_{jk} * w1[c, o]
      w2p[j*H + h, k*C + o] = delta_{jk} * w2[h, o]
    Matmul operands are emitted in bf16 (f32 accumulation happens in-kernel);
    biases stay f32.  In production these would be packed once, not per call."""
    C, H = w1.shape
    eye = jnp.eye(pack, dtype=jnp.float32)
    w1p = jnp.einsum("jk,co->jcko", eye, w1.astype(jnp.float32)).reshape(pack * C, pack * H)
    w2p = jnp.einsum("jk,ho->jhko", eye, w2.astype(jnp.float32)).reshape(pack * H, pack * C)
    b1p = jnp.tile(b1.reshape(1, H), (1, pack)).astype(jnp.float32)
    b2p = jnp.tile(b2.reshape(1, C), (1, pack)).astype(jnp.float32)
    return w1p.astype(jnp.bfloat16), b1p, w2p.astype(jnp.bfloat16), b2p


@functools.partial(jax.jit, static_argnames=("tm",))
def feed_forward(x, w1, b1, w2, b2, *, tm=8192):
    """x: (B, T, C) float32. Returns (B, T, C).  tm = tokens per grid step."""
    B, T, C = x.shape
    H = 4 * C
    assert LANES % C == 0, "channel dim must divide 128 for lane packing"
    pack = LANES // C                                    # tokens per 128-lane row (4)

    M = B * T
    x2d = x.reshape(M, C)

    # Common case (M % 32 == 0): pure bitcast reshapes, zero extra HBM traffic.
    # Otherwise pad token rows up to 8 packed rows worth and slice at the end
    # (rare: tiny or odd token counts).
    row_align = pack * 8
    m_pad = _round_up(M, row_align)
    padded = m_pad != M
    if padded:
        x2d = jnp.pad(x2d, ((0, m_pad - M), (0, 0)))
    mp = m_pad // pack                                   # packed rows, multiple of 8
    xp = x2d.reshape(mp, pack * C)                       # lane-dense packed tokens

    # Row tile: as large as requested, never exceeding the problem, and capped
    # so the grid has >= 2 steps when possible (keeps both v7x TCs busy).
    tmp = max(8, (tm // pack) // 8 * 8)
    tmp = min(tmp, mp)
    if mp >= 16:
        tmp = min(tmp, _round_up(-(-mp // 2), 8))
    grid = (pl.cdiv(mp, tmp),)      # ragged last block: Pallas masks the writeback

    w1p, b1p, w2p, b2p = _pack_weights(w1, b1, w2, b2, pack)

    # Advisory cost: actual MXU work (4x logical flops due to block-diagonal
    # padding) and actual bytes per dtype.
    flops = 2 * mp * ((pack * C) * (pack * H) + (pack * H) * (pack * C))
    bytes_accessed = (2 * mp * pack * C * 4              # x in + y out (f32)
                      + (w1p.size + w2p.size) * 2        # bf16 packed weights
                      + (b1p.size + b2p.size) * 4)       # f32 biases

    outp = pl.pallas_call(
        _ffn_kernel,
        out_shape=jax.ShapeDtypeStruct((mp, pack * C), x.dtype),
        grid_spec=pltpu.PrefetchScalarGridSpec(
            num_scalar_prefetch=0,
            grid=grid,
            in_specs=[
                pl.BlockSpec((tmp, pack * C), lambda i: (i, 0)),        # x tile
                pl.BlockSpec((pack * C, pack * H), lambda i: (0, 0)),   # W1 packed (resident)
                pl.BlockSpec((1, pack * H), lambda i: (0, 0)),          # b1 packed
                pl.BlockSpec((pack * H, pack * C), lambda i: (0, 0)),   # W2 packed (resident)
                pl.BlockSpec((1, pack * C), lambda i: (0, 0)),          # b2 packed
            ],
            out_specs=pl.BlockSpec((tmp, pack * C), lambda i: (i, 0)),
        ),
        compiler_params=pltpu.CompilerParams(
            dimension_semantics=("parallel",),
        ),
        cost_estimate=pl.CostEstimate(
            flops=flops, transcendentals=0, bytes_accessed=bytes_accessed),
    )(xp, w1p, b1p, w2p, b2p)

    out2d = outp.reshape(m_pad, C)                       # un-pack rows (bitcast)
    if padded:
        out2d = out2d[:M]
    return out2d.reshape(B, T, C)


def init_params(key, n_embd=N_EMBD):
    """Deterministic init mimicking torch.nn.Linear (uniform +-1/sqrt(fan_in))."""
    k1, k2, k3, k4 = jax.random.split(key, 4)
    bound1 = 1.0 / jnp.sqrt(jnp.float32(n_embd))
    bound2 = 1.0 / jnp.sqrt(jnp.float32(4 * n_embd))
    w1 = jax.random.uniform(k1, (n_embd, 4 * n_embd), jnp.float32, -bound1, bound1)
    b1 = jax.random.uniform(k2, (1, 4 * n_embd), jnp.float32, -bound1, bound1)
    w2 = jax.random.uniform(k3, (4 * n_embd, n_embd), jnp.float32, -bound2, bound2)
    b2 = jax.random.uniform(k4, (1, n_embd), jnp.float32, -bound2, bound2)
    return w1, b1, w2, b2


def _reference(x, w1, b1, w2, b2):
    return jnp.maximum(x @ w1 + b1[0], 0.0) @ w2 + b2[0]


if __name__ == "__main__":
    key = jax.random.PRNGKey(0)
    kx, kp, kx2 = jax.random.split(key, 3)
    w1, b1, w2, b2 = init_params(kp)

    # Small shape matching the module (padded-rows path, single grid step).
    B, T, C = 2, 8, N_EMBD
    x = jax.random.normal(kx, (B, T, C), jnp.float32)
    out = feed_forward(x, w1, b1, w2, b2)
    jax.block_until_ready(out)
    ref = _reference(x, w1, b1, w2, b2)
    assert out.shape == (B, T, C)
    # bf16 MXU operands with f32 accumulation -> relaxed tolerance vs f32 ref.
    assert jnp.allclose(out, ref, atol=3e-2, rtol=3e-2), "mismatch vs reference"

    # Second check: copy-free path (M % 32 == 0) with a >=2-step parallel grid.
    B2, T2 = 4, 256
    x2 = jax.random.normal(kx2, (B2, T2, C), jnp.float32)
    out2 = feed_forward(x2, w1, b1, w2, b2, tm=512)
    jax.block_until_ready(out2)
    ref2 = _reference(x2, w1, b1, w2, b2)
    assert out2.shape == (B2, T2, C)
    assert jnp.allclose(out2, ref2, atol=3e-2, rtol=3e-2), "mismatch vs reference (large)"

    print("KERNEL_OK")
</pallas_src>

<mosaic_0001>
module attributes {stable_mosaic.version = 11 : i64} {
  func.func @_ffn_kernel(%arg0: i32, %arg1: memref<8x128xf32, #tpu.memory_space<vmem>>, %arg2: memref<128x512xbf16, #tpu.memory_space<vmem>>, %arg3: memref<1x512xf32, #tpu.memory_space<vmem>>, %arg4: memref<512x128xbf16, #tpu.memory_space<vmem>>, %arg5: memref<1x128xf32, #tpu.memory_space<vmem>>, %arg6: memref<8x128xf32, #tpu.memory_space<vmem>>) attributes {dimension_semantics = [#tpu.dimension_semantics<parallel>], iteration_bounds = array<i64: 1>, scalar_prefetch = 0 : i64, scratch_operands = 0 : i64, tpu.core_type = #tpu.core_type<tc>, window_params = [{transform_indices = @transform_0, window_bounds = array<i64: 8, 128>}, {pipeline_mode = #tpu.pipeline_mode<synchronous>, transform_indices = @transform_1, window_bounds = array<i64: 128, 512>}, {pipeline_mode = #tpu.pipeline_mode<synchronous>, transform_indices = @transform_2, window_bounds = array<i64: 1, 512>}, {pipeline_mode = #tpu.pipeline_mode<synchronous>, transform_indices = @transform_3, window_bounds = array<i64: 512, 128>}, {pipeline_mode = #tpu.pipeline_mode<synchronous>, transform_indices = @transform_4, window_bounds = array<i64: 1, 128>}, {transform_indices = @transform_5, window_bounds = array<i64: 8, 128>}]} {
    %c0 = arith.constant 0 : index
    %c0_0 = arith.constant 0 : index
    %0 = vector.load %arg1[%c0, %c0_0] : memref<8x128xf32, #tpu.memory_space<vmem>>, vector<8x128xf32>
    %1 = arith.truncf %0 : vector<8x128xf32> to vector<8x128xbf16>
    %c0_1 = arith.constant 0 : index
    %c0_2 = arith.constant 0 : index
    %2 = vector.load %arg2[%c0_1, %c0_2] : memref<128x512xbf16, #tpu.memory_space<vmem>>, vector<128x512xbf16>
    %cst = arith.constant dense<0.000000e+00> : vector<8x512xf32>
    %3 = tpu.matmul %1, %2, %cst {dimension_numbers = #tpu.dot_dimension_numbers<[1], [0], [0], [1], [0, 0, 1, 1], [], []>} : vector<8x128xbf16>, vector<128x512xbf16>, vector<8x512xf32> -> vector<8x512xf32>
    %c0_3 = arith.constant 0 : index
    %c0_4 = arith.constant 0 : index
    %4 = vector.load %arg3[%c0_3, %c0_4] : memref<1x512xf32, #tpu.memory_space<vmem>>, vector<1x512xf32>
    %5 = vector.broadcast %4 : vector<1x512xf32> to vector<8x512xf32>
    %6 = arith.addf %3, %5 : vector<8x512xf32>
    %cst_5 = arith.constant 0.000000e+00 : f32
    %7 = vector.broadcast %cst_5 : f32 to vector<8x512xf32>
    %8 = arith.maximumf %6, %7 : vector<8x512xf32>
    %9 = arith.truncf %8 : vector<8x512xf32> to vector<8x512xbf16>
    %c0_6 = arith.constant 0 : index
    %c0_7 = arith.constant 0 : index
    %10 = vector.load %arg4[%c0_6, %c0_7] : memref<512x128xbf16, #tpu.memory_space<vmem>>, vector<512x128xbf16>
    %cst_8 = arith.constant dense<0.000000e+00> : vector<8x128xf32>
    %11 = tpu.matmul %9, %10, %cst_8 {dimension_numbers = #tpu.dot_dimension_numbers<[1], [0], [0], [1], [0, 0, 1, 1], [], []>} : vector<8x512xbf16>, vector<512x128xbf16>, vector<8x128xf32> -> vector<8x128xf32>
    %c0_9 = arith.constant 0 : index
    %c0_10 = arith.constant 0 : index
    %12 = vector.load %arg5[%c0_9, %c0_10] : memref<1x128xf32, #tpu.memory_space<vmem>>, vector<1x128xf32>
    %13 = vector.broadcast %12 : vector<1x128xf32> to vector<8x128xf32>
    %14 = arith.addf %11, %13 : vector<8x128xf32>
    %c0_11 = arith.constant 0 : index
    %c0_12 = arith.constant 0 : index
    %15 = vector.load %arg6[%c0_11, %c0_12] : memref<8x128xf32, #tpu.memory_space<vmem>>, vector<8x128xf32>
    tpu.vector_store %arg6[%c0_11, %c0_12], %14 {strides = array<i32>} : memref<8x128xf32, #tpu.memory_space<vmem>>, vector<8x128xf32>,
    return
  }
  func.func @transform_0(%arg0: i32) -> (i32, i32) {
    %c0_i32 = arith.constant 0 : i32
    %c0_i32_0 = arith.constant 0 : i32
    return %arg0, %c0_i32 : i32, i32
  }
  func.func @transform_1(%arg0: i32) -> (i32, i32) {
    %c0_i32 = arith.constant 0 : i32
    %c0_i32_0 = arith.constant 0 : i32
    %c0_i32_1 = arith.constant 0 : i32
    return %c0_i32, %c0_i32_0 : i32, i32
  }
  func.func @transform_2(%arg0: i32) -> (i32, i32) {
    %c0_i32 = arith.constant 0 : i32
    %c0_i32_0 = arith.constant 0 : i32
    %c0_i32_1 = arith.constant 0 : i32
    return %c0_i32, %c0_i32_0 : i32, i32
  }
  func.func @transform_3(%arg0: i32) -> (i32, i32) {
    %c0_i32 = arith.constant 0 : i32
    %c0_i32_0 = arith.constant 0 : i32
    %c0_i32_1 = arith.constant 0 : i32
    return %c0_i32, %c0_i32_0 : i32, i32
  }
  func.func @transform_4(%arg0: i32) -> (i32, i32) {
    %c0_i32 = arith.constant 0 : i32
    %c0_i32_0 = arith.constant 0 : i32
    %c0_i32_1 = arith.constant 0 : i32
    return %c0_i32, %c0_i32_0 : i32, i32
  }
  func.func @transform_5(%arg0: i32) -> (i32, i32) {
    %c0_i32 = arith.constant 0 : i32
    %c0_i32_0 = arith.constant 0 : i32
    return %arg0, %c0_i32 : i32, i32
  }
}

</mosaic_0001>

<bundles_post_ra>
// kernel: feed_forward.1
= control target key start
LH: loop header
LB: loop body
LE: loop exit
PB: predicated region body
PF: predicated region fallthrough
CT: control target
= control target key end

     0   :  { %s1252_s1 = inlined_call_operand.vmem [shape: bf16[128,512], index: 1, kind: input, shape index: {}]   ;;  %s1253_s0 = inlined_call_operand.vmem [shape: f32[8,128], index: 0, kind: input, shape index: {}]   ;;  %s1254_s3 = inlined_call_operand.vmem [shape: bf16[512,128], index: 3, kind: input, shape index: {}]   ;;  %s1255_s4 = inlined_call_operand.vmem [shape: f32[1,128], index: 4, kind: input, shape index: {}]   ;;  %s1256_s2 = inlined_call_operand.vmem [shape: f32[1,512], index: 2, kind: input, shape index: {}]   ;;  %s1257_s5 = inlined_call_operand.vmem [shape: f32[8,128], index: 5, kind: output, shape index: {}]  }
   0x1   :  { %v723_v0 = vld [vmem:[%s1252_s1 + $0xe8] sm:$0xf]  ;;  %v888_v1 = vld [vmem:[%s1252_s1 + $0xf4] sm:$0xf0]  ;;  %v886_v2 = vld [vmem:[%s1252_s1 + $0xec] sm:$0xf] }
   0x2   :  { %v724_v3 = vor.u32 %v888_v1, %v723_v0  ;;  %v725_v4 = vld [vmem:[%s1252_s1 + $0xf8] sm:$0xf0]  ;;  %v715_v5 = vld [vmem:[%s1252_s1 + $0xe0] sm:$0xf]  ;;  %v887_v6 = vld [vmem:[%s1252_s1 + $0xec] sm:$0xf0] }
   0x3   :  { %v728_v7 = vor.u32 %v886_v2, %v725_v4  ;;  %v716_v8 = vor.u32 %v887_v6, %v715_v5  ;;  %v885_v9 = vld [vmem:[%s1252_s1 + $0xe4] sm:$0xf]  ;;  %v717_v10 = vld [vmem:[%s1252_s1 + $0xf0] sm:$0xf0]  ;;  %v707_v11 = vld [vmem:[%s1252_s1 + $0xc8] sm:$0xf] }
   0x4   :  { %250 = vmatpush.bf16.msra.mxu2 %v724_v3  ;;  %v720_v12 = vor.u32 %v885_v9, %v717_v10  ;;  %v884_v13 = vld [vmem:[%s1252_s1 + $0xd4] sm:$0xf0]  ;;  %v882_v14 = vld [vmem:[%s1252_s1 + $0xcc] sm:$0xf]  ;;  %v709_v15 = vld [vmem:[%s1252_s1 + $0xd8] sm:$0xf0] }
   0x5   :  { %263 = vmatpush.bf16.msra.mxu3 %v728_v7  ;;  %224 = vmatpush.bf16.msra.mxu0 %v716_v8  ;;  %v708_v16 = vor.u32 %v884_v13, %v707_v11  ;;  %v712_v17 = vor.u32 %v882_v14, %v709_v15  ;;  %v699_v18 = vld [vmem:[%s1252_s1 + $0xc0] sm:$0xf]  ;;  %v883_v19 = vld [vmem:[%s1252_s1 + $0xcc] sm:$0xf0]  ;;  %v881_v20 = vld [vmem:[%s1252_s1 + $0xc4] sm:$0xf] }
   0x6   :  { %237 = vmatpush.bf16.msra.mxu1 %v720_v12  ;;  %v700_v21 = vor.u32 %v883_v19, %v699_v18  ;;  %v701_v22 = vld [vmem:[%s1252_s1 + $0xd0] sm:$0xf0]  ;;  %v691_v23 = vld [vmem:[%s1252_s1 + $0xa8] sm:$0xf]  ;;  %v880_v24 = vld [vmem:[%s1252_s1 + $0xb4] sm:$0xf0] }
   0x7   :  { %v704_v25 = vor.u32 %v881_v20, %v701_v22  ;;  %v878_v26 = vld [vmem:[%s1252_s1 + $0xac] sm:$0xf]  ;;  %v693_v27 = vld [vmem:[%s1252_s1 + $0xb8] sm:$0xf0]  ;;  %v683_v28 = vld [vmem:[%s1252_s1 + $0xa0] sm:$0xf]  ;;  %v692_v29 = vor.u32 %v880_v24, %v691_v23 }
   0x8   :  { %251 = vmatpush.bf16.msra.mxu2 %v708_v16  ;;  %v879_v30 = vld [vmem:[%s1252_s1 + $0xac] sm:$0xf0]  ;;  %v877_v31 = vld [vmem:[%s1252_s1 + $0xa4] sm:$0xf]  ;;  %v685_v32 = vld [vmem:[%s1252_s1 + $0xb0] sm:$0xf0]  ;;  %v696_v33 = vor.u32 %v878_v26, %v693_v27 }
   0x9   :  { %264 = vmatpush.bf16.msra.mxu3 %v712_v17  ;;  %225 = vmatpush.bf16.msra.mxu0 %v700_v21  ;;  %v684_v34 = vor.u32 %v879_v30, %v683_v28  ;;  %v675_v35 = vld [vmem:[%s1252_s1 + $0x88] sm:$0xf]  ;;  %v876_v36 = vld [vmem:[%s1252_s1 + $0x94] sm:$0xf0]  ;;  %v874_v37 = vld [vmem:[%s1252_s1 + $0x8c] sm:$0xf]  ;;  %v688_v38 = vor.u32 %v877_v31, %v685_v32 }
   0xa   :  { %238 = vmatpush.bf16.msra.mxu1 %v704_v25  ;;  %v677_v39 = vld [vmem:[%s1252_s1 + $0x98] sm:$0xf0]  ;;  %v667_v40 = vld [vmem:[%s1252_s1 + $0x80] sm:$0xf]  ;;  %v875_v41 = vld [vmem:[%s1252_s1 + $0x8c] sm:$0xf0]  ;;  %v676_v44 = vor.u32 %v876_v36, %v675_v35 }
   0xb   :  { %v873_v42 = vld [vmem:[%s1252_s1 + $0x84] sm:$0xf]  ;;  %v669_v43 = vld [vmem:[%s1252_s1 + $0x90] sm:$0xf0]  ;;  %v680_v45 = vor.u32 %v874_v37, %v677_v39  ;;  %v668_v46 = vor.u32 %v875_v41, %v667_v40  ;;  %v659_v47 = vld [vmem:[%s1252_s1 + $0x68] sm:$0xf] }
   0xc   :  { %252 = vmatpush.bf16.msra.mxu2 %v692_v29  ;;  %v872_v48 = vld [vmem:[%s1252_s1 + $0x74] sm:$0xf0]  ;;  %v870_v49 = vld [vmem:[%s1252_s1 + $0x6c] sm:$0xf]  ;;  %v672_v50 = vor.u32 %v873_v42, %v669_v43  ;;  %v661_v51 = vld [vmem:[%s1252_s1 + $0x78] sm:$0xf0] }
   0xd   :  { %265 = vmatpush.bf16.msra.mxu3 %v696_v33  ;;  %226 = vmatpush.bf16.msra.mxu0 %v684_v34  ;;  %v651_v52 = vld [vmem:[%s1252_s1 + $0x60] sm:$0xf]  ;;  %v871_v53 = vld [vmem:[%s1252_s1 + $0x6c] sm:$0xf0]  ;;  %v869_v54 = vld [vmem:[%s1252_s1 + $0x64] sm:$0xf]  ;;  %v660_v56 = vor.u32 %v872_v48, %v659_v47  ;;  %v664_v57 = vor.u32 %v870_v49, %v661_v51 }
   0xe   :  { %239 = vmatpush.bf16.msra.mxu1 %v688_v38  ;;  %v653_v55 = vld [vmem:[%s1252_s1 + $0x70] sm:$0xf0]  ;;  %v652_v58 = vor.u32 %v871_v53, %v651_v52  ;;  %v643_v59 = vld [vmem:[%s1252_s1 + $0x48] sm:$0xf]  ;;  %v868_v60 = vld [vmem:[%s1252_s1 + $0x54] sm:$0xf0] }
   0xf   :  { %v866_v61 = vld [vmem:[%s1252_s1 + $0x4c] sm:$0xf]  ;;  %v656_v62 = vor.u32 %v869_v54, %v653_v55  ;;  %v645_v63 = vld [vmem:[%s1252_s1 + $0x58] sm:$0xf0]  ;;  %v635_v0 = vld [vmem:[%s1252_s1 + $0x40] sm:$0xf]  ;;  %v644_v4 = vor.u32 %v868_v60, %v643_v59 }
  0x10   :  { %253 = vmatpush.bf16.msra.mxu2 %v676_v44  ;;  %v867_v1 = vld [vmem:[%s1252_s1 + $0x4c] sm:$0xf0]  ;;  %v865_v2 = vld [vmem:[%s1252_s1 + $0x44] sm:$0xf]  ;;  %v637_v3 = vld [vmem:[%s1252_s1 + $0x50] sm:$0xf0]  ;;  %v648_v5 = vor.u32 %v866_v61, %v645_v63 }
  0x11   :  { %266 = vmatpush.bf16.msra.mxu3 %v680_v45  ;;  %227 = vmatpush.bf16.msra.mxu0 %v668_v46  ;;  %v636_v6 = vor.u32 %v867_v1, %v635_v0  ;;  %v627_v7 = vld [vmem:[%s1252_s1 + $0x28] sm:$0xf]  ;;  %v864_v8 = vld [vmem:[%s1252_s1 + $0x34] sm:$0xf0]  ;;  %v862_v9 = vld [vmem:[%s1252_s1 + $0x2c] sm:$0xf]  ;;  %v640_v10 = vor.u32 %v865_v2, %v637_v3 }
  0x12   :  { %240 = vmatpush.bf16.msra.mxu1 %v672_v50  ;;  %v629_v11 = vld [vmem:[%s1252_s1 + $0x38] sm:$0xf0]  ;;  %v619_v12 = vld [vmem:[%s1252_s1 + $0x20] sm:$0xf]  ;;  %v863_v13 = vld [vmem:[%s1252_s1 + $0x2c] sm:$0xf0]  ;;  %v628_v16 = vor.u32 %v864_v8, %v627_v7 }
  0x13   :  { %v861_v14 = vld [vmem:[%s1252_s1 + $0x24] sm:$0xf]  ;;  %v621_v15 = vld [vmem:[%s1252_s1 + $0x30] sm:$0xf0]  ;;  %v632_v17 = vor.u32 %v862_v9, %v629_v11  ;;  %v620_v18 = vor.u32 %v863_v13, %v619_v12  ;;  %v611_v19 = vld [vmem:[%s1252_s1 + $0x8] sm:$0xf] }
  0x14   :  { %254 = vmatpush.bf16.msra.mxu2 %v660_v56  ;;  %v860_v20 = vld [vmem:[%s1252_s1 + $0x14] sm:$0xf0]  ;;  %v858_v21 = vld [vmem:[%s1252_s1 + $0xc] sm:$0xf]  ;;  %v624_v22 = vor.u32 %v861_v14, %v621_v15  ;;  %v613_v23 = vld [vmem:[%s1252_s1 + $0x18] sm:$0xf0] }
  0x15   :  { %267 = vmatpush.bf16.msra.mxu3 %v664_v57  ;;  %228 = vmatpush.bf16.msra.mxu0 %v652_v58  ;;  %v603_v24 = vld [vmem:[%s1252_s1] sm:$0xf]  ;;  %v859_v25 = vld [vmem:[%s1252_s1 + $0xc] sm:$0xf0]  ;;  %v857_v26 = vld [vmem:[%s1252_s1 + $0x4] sm:$0xf]  ;;  %v612_v28 = vor.u32 %v860_v20, %v611_v19  ;;  %v616_v30 = vor.u32 %v858_v21, %v613_v23 }
  0x16   :  { %241 = vmatpush.bf16.msra.mxu1 %v656_v62  ;;  %v605_v27 = vld [vmem:[%s1252_s1 + $0x10] sm:$0xf0]  ;;  %v20_v29 = vld [vmem:[%s1253_s0] sm:$0xff]  ;;  %v604_v31 = vor.u32 %v859_v25, %v603_v24  ;;  %v896_v33 = vld [vmem:[%s1254_s3 + $0x38] sm:$0xff] }
  0x17   :  { %v608_v32 = vor.u32 %v857_v26, %v605_v27  ;;  %v21_v34 = vpack.c.bf16 %v20_v29, %v20_v29  ;;  %v904_v35 = vld [vmem:[%s1254_s3 + $0x78] sm:$0xff]  ;;  %v895_v38 = vld [vmem:[%s1254_s3 + $0x30] sm:$0xff]  ;;  %v894_v42 = vld [vmem:[%s1254_s3 + $0x28] sm:$0xff] }
  0x18   :  { %255 = vmatpush.bf16.msra.mxu2 %v644_v4  ;;  %v912_v36 = vld [vmem:[%s1254_s3 + $0xb8] sm:$0xff]  ;;  %v903_v39 = vld [vmem:[%s1254_s3 + $0x70] sm:$0xff]  ;;  %v902_v43 = vld [vmem:[%s1254_s3 + $0x68] sm:$0xff] }
  0x19   :  { %268 = vmatpush.bf16.msra.mxu3 %v648_v5  ;;  %229 = vmatpush.bf16.msra.mxu0 %v636_v6  ;;  %v920_v37 = vld [vmem:[%s1254_s3 + $0xf8] sm:$0xff]  ;;  %v911_v40 = vld [vmem:[%s1254_s3 + $0xb0] sm:$0xff]  ;;  %v910_v44 = vld [vmem:[%s1254_s3 + $0xa8] sm:$0xff] }
  0x1a   :  { %242 = vmatpush.bf16.msra.mxu1 %v640_v10  ;;  %v919_v41 = vld [vmem:[%s1254_s3 + $0xf0] sm:$0xff]  ;;  %v918_v45 = vld [vmem:[%s1254_s3 + $0xe8] sm:$0xff]  ;;  %v893_v46 = vld [vmem:[%s1254_s3 + $0x20] sm:$0xff] }
  0x1b   :  { %v901_v47 = vld [vmem:[%s1254_s3 + $0x60] sm:$0xff]  ;;  %v892_v50 = vld [vmem:[%s1254_s3 + $0x18] sm:$0xff]  ;;  %v891_v54 = vld [vmem:[%s1254_s3 + $0x10] sm:$0xff] }
  0x1c   :  { %256 = vmatpush.bf16.msra.mxu2 %v628_v16  ;;  %v909_v48 = vld [vmem:[%s1254_s3 + $0xa0] sm:$0xff]  ;;  %v900_v51 = vld [vmem:[%s1254_s3 + $0x58] sm:$0xff]  ;;  %v899_v55 = vld [vmem:[%s1254_s3 + $0x50] sm:$0xff] }
  0x1d   :  { %269 = vmatpush.bf16.msra.mxu3 %v632_v17  ;;  %230 = vmatpush.bf16.msra.mxu0 %v620_v18  ;;  %v917_v49 = vld [vmem:[%s1254_s3 + $0xe0] sm:$0xff]  ;;  %v908_v52 = vld [vmem:[%s1254_s3 + $0x98] sm:$0xff]  ;;  %v907_v56 = vld [vmem:[%s1254_s3 + $0x90] sm:$0xff] }
  0x1e   :  { %243 = vmatpush.bf16.msra.mxu1 %v624_v22  ;;  %v916_v53 = vld [vmem:[%s1254_s3 + $0xd8] sm:$0xff]  ;;  %v915_v57 = vld [vmem:[%s1254_s3 + $0xd0] sm:$0xff]  ;;  %v890_v58 = vld [vmem:[%s1254_s3 + $0x8] sm:$0xff] }
  0x1f   :  { %v898_v59 = vld [vmem:[%s1254_s3 + $0x48] sm:$0xff]  ;;  %v889_v62 = vld [vmem:[%s1254_s3] sm:$0xff] }
  0x20   :  { %257 = vmatpush.bf16.msra.mxu2 %v612_v28  ;;  %v906_v60 = vld [vmem:[%s1254_s3 + $0x88] sm:$0xff]  ;;  %v897_v63 = vld [vmem:[%s1254_s3 + $0x40] sm:$0xff] }
  0x21   :  { %270 = vmatpush.bf16.msra.mxu3 %v616_v30  ;;  %231 = vmatpush.bf16.msra.mxu0 %v604_v31  ;;  %v914_v61 = vld [vmem:[%s1254_s3 + $0xc8] sm:$0xff]  ;;  %v905_v0 = vld [vmem:[%s1254_s3 + $0x80] sm:$0xff] }
  0x22   :  { %244 = vmatpush.bf16.msra.mxu1 %v608_v32  ;;  %v913_v1 = vld [vmem:[%s1254_s3 + $0xc0] sm:$0xff] }
  0x23   :  { %258 = vmatmul.bf16.vlgmr.msra.gmra.mxu2 %v21_v34  ;;  %v54_v2 = vld [vmem:[%s1256_s2] sm:$0xf] }
  0x24   :  { %271 = vmatmul.bf16.vlgmr.msra.gmra.mxu3 %v21_v34  ;;  %232 = vmatmul.bf16.vlgmr.msra.gmra.mxu0 %v21_v34  ;;  %v56_v3 = vperm.slane %v54_v2, 0  ;;  %v57_v4 = vperm.slane %v54_v2, 1  ;;  %v58_v9 = vperm.slane %v54_v2, 2  ;;  %v59_v11 = vperm.slane %v54_v2, 3  ;;  %v921_v27 = vld [vmem:[%s1255_s4] ss:$0 sm:$0xff] }
  0x25   :  { %544 = vmatpush.bf16.msrb.mxu0 %v896_v33  ;;  %245 = vmatmul.bf16.vlgmr.msra.gmra.mxu1 %v21_v34 }
  0x26   :  { %557 = vmatpush.bf16.msrb.mxu1 %v904_v35  ;;  %570 = vmatpush.bf16.msrb.mxu2 %v912_v36 }
  0x27   :  { %583 = vmatpush.bf16.msrb.mxu3 %v920_v37 }
  0x29   :  { %545 = vmatpush.bf16.msrb.mxu0 %v895_v38 }
  0x2a   :  { %558 = vmatpush.bf16.msrb.mxu1 %v903_v39  ;;  %571 = vmatpush.bf16.msrb.mxu2 %v911_v40 }
  0x2b   :  { %584 = vmatpush.bf16.msrb.mxu3 %v919_v41 }
  0x2d   :  { %546 = vmatpush.bf16.msrb.mxu0 %v894_v42 }
  0x2e   :  { %559 = vmatpush.bf16.msrb.mxu1 %v902_v43  ;;  %572 = vmatpush.bf16.msrb.mxu2 %v910_v44 }
  0x2f   :  { %585 = vmatpush.bf16.msrb.mxu3 %v918_v45 }
  0x31   :  { %547 = vmatpush.bf16.msrb.mxu0 %v893_v46 }
  0x32   :  { %560 = vmatpush.bf16.msrb.mxu1 %v901_v47  ;;  %573 = vmatpush.bf16.msrb.mxu2 %v909_v48 }
  0x33   :  { %586 = vmatpush.bf16.msrb.mxu3 %v917_v49 }
  0x35   :  { %548 = vmatpush.bf16.msrb.mxu0 %v892_v50 }
  0x36   :  { %561 = vmatpush.bf16.msrb.mxu1 %v900_v51  ;;  %574 = vmatpush.bf16.msrb.mxu2 %v908_v52 }
  0x37   :  { %587 = vmatpush.bf16.msrb.mxu3 %v916_v53 }
  0x39   :  { %549 = vmatpush.bf16.msrb.mxu0 %v891_v54 }
  0x3a   :  { %562 = vmatpush.bf16.msrb.mxu1 %v899_v55  ;;  %575 = vmatpush.bf16.msrb.mxu2 %v907_v56 }
  0x3b   :  { %588 = vmatpush.bf16.msrb.mxu3 %v915_v57 }
  0x3d   :  { %550 = vmatpush.bf16.msrb.mxu0 %v890_v58 }
  0x3e   :  { %563 = vmatpush.bf16.msrb.mxu1 %v898_v59  ;;  %576 = vmatpush.bf16.msrb.mxu2 %v906_v60 }
  0x3f   :  { %589 = vmatpush.bf16.msrb.mxu3 %v914_v61 }
  0x41   :  { %551 = vmatpush.bf16.msrb.mxu0 %v889_v62 }
  0x42   :  { %564 = vmatpush.bf16.msrb.mxu1 %v897_v63  ;;  %577 = vmatpush.bf16.msrb.mxu2 %v905_v0 }
  0x43   :  { %590 = vmatpush.bf16.msrb.mxu3 %v913_v1 }
  0xa1   :  { %v233_v5 = vpop.f32.mrf.mxu0 }
  0xa2   :  { %v234_v6 = vadd.f32 %v233_v5, %v56_v3  ;;  %v246_v7 = vpop.f32.mrf.mxu1 }
  0xa3   :  { %v247_v8 = vadd.f32 %v246_v7, %v57_v4 }
  0xa4   :  { %v276_v10 = vmax.f32 %v234_v6, 0.0 }
  0xa5   :  { %v277_v12 = vmax.f32 %v247_v8, 0.0 }
  0xa6   :  { %v280_v13 = vpack.c.bf16 %v276_v10, %v276_v10  ;;  %v259_v14 = vpop.f32.mrf.mxu2 }
  0xa7   :  { %v281_v15 = vpack.c.bf16 %v277_v12, %v277_v12  ;;  %v260_v16 = vadd.f32 %v259_v14, %v58_v9  ;;  %v272_v17 = vpop.f32.mrf.mxu3 }
  0xa8   :  { %v273_v18 = vadd.f32 %v272_v17, %v59_v11  ;;  %552 = vmatmul.bf16.vlgmr.msrb.gmra.mxu0 %v280_v13 }
  0xa9   :  { %v278_v19 = vmax.f32 %v260_v16, 0.0  ;;  %v235_v20 = vpop.f32.mrf.mxu0  ;;  %565 = vmatmul.bf16.vlgmr.msrb.gmra.mxu1 %v281_v15 }
  0xaa   :  { %v279_v21 = vmax.f32 %v273_v18, 0.0  ;;  %v248_v22 = vpop.f32.mrf.mxu1 }
  0xab   :  { %v282_v23 = vpack.c.bf16 %v278_v19, %v278_v19 }
  0xac   :  { %v283_v24 = vpack.c.bf16 %v279_v21, %v279_v21 }
  0xad   :  { %578 = vmatmul.bf16.vlgmr.msrb.gmra.mxu2 %v282_v23 }
  0xae   :  { %591 = vmatmul.bf16.vlgmr.msrb.gmra.mxu3 %v283_v24  ;;  %v261_v25 = vpop.f32.mrf.mxu2 }
  0xaf   :  { %v274_v26 = vpop.f32.mrf.mxu3 }
 0x125   :  { %v553_v28 = vpop.f32.mrf.mxu0 }
 0x126   :  { %v566_v29 = vpop.f32.mrf.mxu1  ;;  %v554_v30 = vadd.f32 %v921_v27, %v553_v28 }
 0x128   :  { %v567_v31 = vadd.f32 %v566_v29, %v554_v30 }
 0x12d   :  { %v555_v32 = vpop.f32.mrf.mxu0 }
 0x12e   :  { %v568_v33 = vpop.f32.mrf.mxu1 }
 0x130   :  { %v579_v34 = vpop.f32.mrf.mxu2 }
 0x131   :  { %v580_v35 = vadd.f32 %v579_v34, %v567_v31  ;;  %v592_v36 = vpop.f32.mrf.mxu3 }
 0x133   :  { %v593_v37 = vadd.f32 %v592_v36, %v580_v35 }
 0x135   :  { %596 = vst [vmem:[%s1257_s5] sm:$0xff] %v593_v37 }
 0x138   :  { %v581_v38 = vpop.f32.mrf.mxu2 }
 0x139   :  { %v594_v39 = vpop.f32.mrf.mxu3 }

</bundles_post_ra>
